<compile_context>
chip_gen: v6e
topology: v6e:2x2x1
jax: 0.10.0
libtpu: 0.0.40
codegen_flags: <defaults>
</compile_context>

<pallas_src>
import functools

import numpy as np
import jax
import jax.numpy as jnp
from jax import lax
from jax.experimental import pallas as pl
from jax.experimental.pallas import tpu as pltpu


def _decoder_kernel(x_ref, w_ref, o_ref, carry_ref, *, S_pad, T_total, compute_dtype):
    """One (batch, time-tile) grid step.

    x_ref:     (1, N, tT)   float32   tile of input frames (last tile may be ragged / padded)
    w_ref:     (N, Lp)      bf16      full (L-padded) weight, resident in VMEM
    o_ref:     (1, Sp, tT)  float32   output frames, frame index on the lane axis
    carry_ref: (Sp, 1)      float32   VMEM scratch: y2 of the previous tile's last frame
    """
    i = pl.program_id(1)
    N = x_ref.shape[1]
    tT = o_ref.shape[2]

    # First time tile of each batch element: frame -1 does not exist -> zero carry.
    @pl.when(i == 0)
    def _():
        carry_ref[...] = jnp.zeros_like(carry_ref)

    # Zero columns at/after the last real input frame.  This handles both the ragged final tile
    # (block reads past T return unspecified data) and the implicit zero frame that produces the
    # (T+1)-th output frame.  Cast to bf16 in-register for the MXU.
    valid = T_total - i * tT
    col = lax.broadcasted_iota(jnp.int32, (N, tT), 1)
    x = jnp.where(col < valid, x_ref[0], 0.0).astype(compute_dtype)      # (N, tT)

    w = w_ref[...]                                                        # (N, Lp)

    # y[l, c] = sum_n w[n, l] * x[n, c]; transposed LHS fed natively to the MXU,
    # f32 accumulation, frames stay on the lane axis.
    y = lax.dot_general(
        w, x,
        dimension_numbers=(((0,), (0,)), ((), ())),
        preferred_element_type=jnp.float32,
    )                                                                     # (Lp, tT) f32
    y1 = y[:S_pad, :]            # frame j's contribution to output frame j      (Sp, tT)
    y2 = y[S_pad:, :]            # frame j's contribution to output frame j + 1  (Sp, tT)

    # Overlap-add: shift y2 right by one frame (one lane, on the XLU), store, then fix column 0
    # with the carry from the previous tile (single-column overwrite, no full-tile select).
    y2_shift = pltpu.roll(y2, shift=1, axis=1)                   # column c <- y2[:, c - 1]
    o_ref[0] = (y1 + y2_shift).astype(o_ref.dtype)
    o_ref[0, :, 0:1] = (y1[:, 0:1] + carry_ref[...]).astype(o_ref.dtype)

    # Seam carry for the next time tile of the same batch element.
    carry_ref[...] = y2[:, tT - 1:tT]


def decoder_forward(x, w, L, *, block_frames=None, compute_dtype=jnp.bfloat16):
    """x: (B, N, T) float, w: (N, L) float -> (B, 1, T_out) float32 (ConvTranspose1d, no bias)."""
    B, N, T = x.shape
    assert L % 2 == 0, "kernel assumes even L (stride = L // 2)"
    S = L // 2
    Sp = ((S + 7) // 8) * 8          # sublane-aligned half-frame
    Lp = 2 * Sp
    T_out = (T - 1) * S + L          # == (T + 1) * S for even L
    n_frames = T + 1                 # number of S-sample output frames

    # Time tile (frames per grid step): multiple of 128 lanes; auto-sized so the f32 x tile is a
    # few MiB (tile DMA time >> per-step pipeline overhead), capped at 8192 frames.
    if block_frames is None:
        tT = (6 * 1024 * 1024) // (4 * N)
        tT = max(128, min(8192, (tT // 128) * 128))
    else:
        tT = max(128, (int(block_frames) // 128) * 128)
    tT = min(tT, pl.cdiv(n_frames, 128) * 128)
    T_pad = pl.cdiv(n_frames, tT) * tT
    nT = T_pad // tT
    nX = max(pl.cdiv(T, tT), 1)      # number of time tiles that overlap real input columns

    x = jnp.asarray(x, jnp.float32)
    w = jnp.asarray(w, jnp.float32)

    # Pad the weight's L dimension so each half is sublane-aligned (Sp multiple of 8); the padded
    # output rows are all-zero and dropped in the wrapper.
    if Sp != S:
        w_pad = jnp.zeros((N, Lp), jnp.float32)
        w_pad = w_pad.at[:, :S].set(w[:, :S])
        w_pad = w_pad.at[:, Sp:Sp + S].set(w[:, S:])
    else:
        w_pad = w
    w_c = w_pad.astype(compute_dtype)

    # Scoped-VMEM limit from the actual footprint (double-buffered tiles) + headroom.
    x_tile_bytes = N * tT * 4
    o_tile_bytes = Sp * tT * 4
    w_bytes = N * Lp * jnp.dtype(compute_dtype).itemsize
    footprint = 2 * x_tile_bytes + 2 * o_tile_bytes + 2 * w_bytes + Sp * 4
    vmem_limit = int(min(64 * 1024 * 1024,
                         max(footprint + 4 * 1024 * 1024, 16 * 1024 * 1024)))

    cost = pl.CostEstimate(
        flops=2 * B * T_pad * N * Lp,
        transcendentals=0,
        bytes_accessed=int(B * N * T * 4 + w_bytes + B * Sp * T_pad * 4),
    )

    kernel = functools.partial(_decoder_kernel, S_pad=Sp, T_total=T,
                               compute_dtype=compute_dtype)

    frames = pl.pallas_call(
        kernel,
        out_shape=jax.ShapeDtypeStruct((B, Sp, T_pad), jnp.float32),
        grid_spec=pltpu.PrefetchScalarGridSpec(
            num_scalar_prefetch=0,
            grid=(B, nT),
            in_specs=[
                # Clamp so a final all-padding tile never starts past the end of x; its columns
                # are fully masked in-kernel anyway.
                pl.BlockSpec((1, N, tT), lambda b, i: (b, 0, jnp.minimum(i, nX - 1))),
                pl.BlockSpec((N, Lp), lambda b, i: (0, 0)),     # weight resident across steps
            ],
            out_specs=pl.BlockSpec((1, Sp, tT), lambda b, i: (b, 0, i)),
            scratch_shapes=[pltpu.VMEM((Sp, 1), jnp.float32)],  # cross-tile seam carry
        ),
        compiler_params=pltpu.CompilerParams(
            dimension_semantics=("parallel", "arbitrary"),
            vmem_limit_bytes=vmem_limit,
        ),
        cost_estimate=cost,
    )(x, w_c)

    # (B, Sp, T_pad) frame-major -> time-major; drop the Sp-S zero sample rows and padded frames.
    out = jnp.transpose(frames, (0, 2, 1))[:, :, :S].reshape(B, 1, T_pad * S)[:, :, :T_out]
    return out


def decoder_reference(x, w, L):
    """Plain-numpy ConvTranspose1d reference (stride = L//2, no padding, no bias)."""
    B, N, T = x.shape
    S = L // 2
    T_out = (T - 1) * S + L
    out = np.zeros((B, 1, T_out), dtype=np.float32)
    for t in range(T):
        frame = np.einsum("bn,nl->bl", x[:, :, t], w)   # (B, L)
        out[:, 0, t * S:t * S + L] += frame
    return out


if __name__ == "__main__":
    def run_case(B, N, T, L, block_frames=None):
        key = jax.random.PRNGKey(0)
        kx, kw = jax.random.split(key)
        x = jax.random.normal(kx, (B, N, T), dtype=jnp.float32)
        bound = 1.0 / float(np.sqrt(N * L))
        w = jax.random.uniform(kw, (N, L), dtype=jnp.float32, minval=-bound, maxval=bound)

        out = jax.block_until_ready(decoder_forward(x, w, L, block_frames=block_frames))

        # Reference on bf16-rounded inputs (kernel uses bf16 MXU inputs with f32 accumulation).
        xr = np.asarray(x.astype(jnp.bfloat16).astype(jnp.float32))
        wr = np.asarray(w.astype(jnp.bfloat16).astype(jnp.float32))
        ref = decoder_reference(xr, wr, L)
        np.testing.assert_allclose(np.asarray(out), ref, rtol=2e-3, atol=2e-3)

    # Decoder(L=8, N=32): S=4 -> exercises the sublane-padding (Sp=8) path, single ragged tile.
    run_case(B=2, N=32, T=16, L=8)
    # Multi-tile path: cross-tile seam carry + ragged (masked) last tile.
    run_case(B=2, N=32, T=300, L=16, block_frames=128)
    # T an exact multiple of the tile: final tile carries only the implicit zero frame
    # (exercises the clamped x index_map + full-tile mask).
    run_case(B=1, N=64, T=256, L=16, block_frames=128)

    print("KERNEL_OK")
</pallas_src>

<mosaic_0001>
module attributes {stable_mosaic.version = 11 : i64} {
  func.func @_decoder_kernel(%arg0: i32, %arg1: i32, %arg2: memref<1x32x128xf32, #tpu.memory_space<vmem>>, %arg3: memref<32x16xbf16, #tpu.memory_space<vmem>>, %arg4: memref<1x8x128xf32, #tpu.memory_space<vmem>>, %arg5: memref<8x1xf32, #tpu.memory_space<vmem>>) attributes {dimension_semantics = [#tpu.dimension_semantics<parallel>, #tpu.dimension_semantics<arbitrary>], iteration_bounds = array<i64: 2, 1>, scalar_prefetch = 0 : i64, scratch_operands = 1 : i64, tpu.core_type = #tpu.core_type<tc>, window_params = [{transform_indices = @transform_0, window_bounds = array<i64: 1, 32, 128>}, {pipeline_mode = #tpu.pipeline_mode<synchronous>, transform_indices = @transform_1, window_bounds = array<i64: 32, 16>}, {transform_indices = @transform_2, window_bounds = array<i64: 1, 8, 128>}]} {
    %c0_i32 = arith.constant 0 : i32
    %0 = arith.cmpi eq, %arg1, %c0_i32 : i32
    %1 = arith.extui %0 : i1 to i32
    %c0_i32_0 = arith.constant 0 : i32
    %2 = arith.cmpi ne, %1, %c0_i32_0 : i32
    scf.if %2 {
      %cst_16 = arith.constant 0.000000e+00 : f32
      %30 = vector.broadcast %cst_16 : f32 to vector<8x1xf32>
      %c0_17 = arith.constant 0 : index
      %c0_18 = arith.constant 0 : index
      %31 = vector.load %arg5[%c0_17, %c0_18] : memref<8x1xf32, #tpu.memory_space<vmem>>, vector<8x1xf32>
      tpu.vector_store %arg5[%c0_17, %c0_18], %30 {strides = array<i32>} : memref<8x1xf32, #tpu.memory_space<vmem>>, vector<8x1xf32>,
    } else {
    }
    %c128_i32 = arith.constant 128 : i32
    %3 = arith.muli %arg1, %c128_i32 : i32
    %c16_i32 = arith.constant 16 : i32
    %4 = arith.subi %c16_i32, %3 : i32
    %5 = tpu.iota {dimensions = array<i32: 1>} : vector<32x128xi32>
    %6 = vector.broadcast %4 : i32 to vector<32x128xi32>
    %7 = arith.cmpi slt, %5, %6 : vector<32x128xi32>
    %c0 = arith.constant 0 : index
    %c0_1 = arith.constant 0 : index
    %c0_2 = arith.constant 0 : index
    %8 = vector.load %arg2[%c0, %c0_1, %c0_2] : memref<1x32x128xf32, #tpu.memory_space<vmem>>, vector<1x32x128xf32>
    %9 = vector.shape_cast %8 : vector<1x32x128xf32> to vector<32x128xf32>
    %cst = arith.constant 0.000000e+00 : f32
    %10 = vector.broadcast %cst : f32 to vector<32x128xf32>
    %11 = arith.select %7, %9, %10 : vector<32x128xi1>, vector<32x128xf32>
    %12 = arith.truncf %11 : vector<32x128xf32> to vector<32x128xbf16>
    %c0_3 = arith.constant 0 : index
    %c0_4 = arith.constant 0 : index
    %13 = vector.load %arg3[%c0_3, %c0_4] : memref<32x16xbf16, #tpu.memory_space<vmem>>, vector<32x16xbf16>
    %cst_5 = arith.constant dense<0.000000e+00> : vector<16x128xf32>
    %14 = tpu.matmul %13, %12, %cst_5 {dimension_numbers = #tpu.dot_dimension_numbers<[0], [0], [1], [1], [0, 1, 1, 1], [], []>} : vector<32x16xbf16>, vector<32x128xbf16>, vector<16x128xf32> -> vector<16x128xf32>
    %15 = vector.extract_strided_slice %14 {offsets = [0, 0], sizes = [8, 128], strides = [1, 1]} : vector<16x128xf32> to vector<8x128xf32>
    %16 = vector.extract_strided_slice %14 {offsets = [8, 0], sizes = [8, 128], strides = [1, 1]} : vector<16x128xf32> to vector<8x128xf32>
    %c1_i32 = arith.constant 1 : i32
    %17 = tpu.dynamic_rotate %16 by %c1_i32 dim 1 : vector<8x128xf32>, i32 -> vector<8x128xf32>
    %18 = arith.addf %15, %17 : vector<8x128xf32>
    %c0_6 = arith.constant 0 : index
    %c0_7 = arith.constant 0 : index
    %c0_8 = arith.constant 0 : index
    %19 = vector.load %arg4[%c0_6, %c0_7, %c0_8] : memref<1x8x128xf32, #tpu.memory_space<vmem>>, vector<1x8x128xf32>
    %20 = vector.shape_cast %19 : vector<1x8x128xf32> to vector<8x128xf32>
    %21 = vector.shape_cast %18 : vector<8x128xf32> to vector<1x8x128xf32>
    tpu.vector_store %arg4[%c0_6, %c0_7, %c0_8], %21 {strides = array<i32>} : memref<1x8x128xf32, #tpu.memory_space<vmem>>, vector<1x8x128xf32>,
    %22 = vector.extract_strided_slice %15 {offsets = [0, 0], sizes = [8, 1], strides = [1, 1]} : vector<8x128xf32> to vector<8x1xf32>
    %c0_9 = arith.constant 0 : index
    %c0_10 = arith.constant 0 : index
    %23 = vector.load %arg5[%c0_9, %c0_10] : memref<8x1xf32, #tpu.memory_space<vmem>>, vector<8x1xf32>
    %24 = arith.addf %22, %23 : vector<8x1xf32>
    %c0_11 = arith.constant 0 : index
    %c0_12 = arith.constant 0 : index
    %c0_13 = arith.constant 0 : index
    %25 = vector.load %arg4[%c0_11, %c0_12, %c0_13] : memref<1x8x128xf32, #tpu.memory_space<vmem>>, vector<1x8x1xf32>
    %26 = vector.shape_cast %25 : vector<1x8x1xf32> to vector<8x1xf32>
    %27 = vector.shape_cast %24 : vector<8x1xf32> to vector<1x8x1xf32>
    tpu.vector_store %arg4[%c0_11, %c0_12, %c0_13], %27 {strides = array<i32>} : memref<1x8x128xf32, #tpu.memory_space<vmem>>, vector<1x8x1xf32>,
    %28 = vector.extract_strided_slice %16 {offsets = [0, 127], sizes = [8, 1], strides = [1, 1]} : vector<8x128xf32> to vector<8x1xf32>
    %c0_14 = arith.constant 0 : index
    %c0_15 = arith.constant 0 : index
    %29 = vector.load %arg5[%c0_14, %c0_15] : memref<8x1xf32, #tpu.memory_space<vmem>>, vector<8x1xf32>
    tpu.vector_store %arg5[%c0_14, %c0_15], %28 {strides = array<i32>} : memref<8x1xf32, #tpu.memory_space<vmem>>, vector<8x1xf32>,
    return
  }
  func.func @transform_0(%arg0: i32, %arg1: i32) -> (i32, i32, i32) {
    %c0_i32 = arith.constant 0 : i32
    %0 = arith.minsi %arg1, %c0_i32 : i32
    %c0_i32_0 = arith.constant 0 : i32
    %c0_i32_1 = arith.constant 0 : i32
    return %arg0, %c0_i32_0, %0 : i32, i32, i32
  }
  func.func @transform_1(%arg0: i32, %arg1: i32) -> (i32, i32) {
    %c0_i32 = arith.constant 0 : i32
    %c0_i32_0 = arith.constant 0 : i32
    %c0_i32_1 = arith.constant 0 : i32
    return %c0_i32, %c0_i32_0 : i32, i32
  }
  func.func @transform_2(%arg0: i32, %arg1: i32) -> (i32, i32, i32) {
    %c0_i32 = arith.constant 0 : i32
    %c0_i32_0 = arith.constant 0 : i32
    return %arg0, %c0_i32, %arg1 : i32, i32, i32
  }
}

</mosaic_0001>

<bundles_post_ra>
// kernel: tpu_custom_call.1
= control target key start
LH: loop header
LB: loop body
LE: loop exit
PB: predicated region body
PF: predicated region fallthrough
CT: control target
= control target key end

     0   :  { %7 = vsyncpa [#allocation4], 0  ;;  %s694_s0 = inlined_call_operand.vmem [shape: f32[2,32,16], index: 0, kind: input, shape index: {}]   ;;  %s695_s1 = inlined_call_operand.vmem [shape: bf16[32,16], index: 1, kind: input, shape index: {}]   ;;  %s696_s2 = inlined_call_operand.hbm [shape: f32[2,8,128], index: 2, kind: output, shape index: {}]  }
   0x1   :  { %9 = vsyncpa [#allocation4 + $0x1], 0  ;;  %s574_s9 = smov 0   ;;  %s576_s10 = smov 0  }
   0x2   :  { %s578_s11 = smov 0   ;;  %s580_s12 = smov 0  }
   0x3   :  { %s582_s13 = smov 0   ;;  %s584_s14 = smov 0  }
   0x4 LB: > { %s383_s15 = sadd.s32 4294967295, %s553_s14   ;;  %s384_s16 = sadd.s32 4294967294, %s553_s14   ;;  %s553_s14 = sphi %s584_s14, %s15_s14   ;;  %s549_s13 = sphi %s582_s13, %s703_s13   ;;  %s545_s12 = sphi %s580_s12, %s702_s12   ;;  %s541_s11 = sphi %s578_s11, %s701_s11   ;;  %s537_s10 = sphi %s576_s10, %s700_s10   ;;  %s533_s9 = sphi %s574_s9, %s699_s9  }
   0x5   : > { %s27_s17 = sadd.s32 1, %s549_s13  ;;  %s89_s18 = sadd.s32 1, %s541_s11 }
   0x6   : > { %p29_p0 = scmp.ge.s32.totalorder %s27_s17, 2  ;;  %p99_p1 = scmp.ne.s32.totalorder %s541_s11, %s537_s10 }
   0x7   : > { %p100_p2 = scmp.eq.s32.totalorder %s383_s15, 1  ;;  %p105_p3 = scmp.ne.s32.totalorder %s537_s10, %s533_s9 }
   0x8   : > { %s705_s17 = smov (%p29_p0, %s27_s17), 0  ;;  %p106_p5 = scmp.eq.s32.totalorder %s384_s16, 1 }
   0x9   : > { %p614_p4 = por %p100_p2, %p99_p1  ;;  %s84_s20 = ssub.s32 %s549_s13, %s705_s17 }
   0xa   : > { %p387_p6 = scmp.ge.s32.totalorder %s553_s14, 1  ;;  %p87_p7 = scmp.eq.s32.totalorder %s84_s20, 0 }
   0xb   : > { %p621_p8 = por %p106_p5, %p105_p3  ;;  %p142_p9 = scmp.lt.s32.totalorder %s553_s14, 3 }
   0xc   : > { %s627_s22 = scalar_select %p87_p7, %s541_s11, %s89_s18  }
   0xd   : > { %p143_p10 = pnand %p387_p6, %p142_p9 }
   0xe   : > { %p171_p11 = scmp.lt.s32.totalorder (!%p143_p10), %s545_s12, 1  ;;  %s557_s4 = smov (!%p143_p10), 1  }
   0xf   : > { %146 = sbr.rel (%p143_p10) target bundleno = 449 (0x1c1), region = 28  ;;  %s166_s5 = sand.u32 (!%p143_p10), 1, %s537_s10  }
  0x10   : > { %s388_s6 = sshll.u32 (!%p143_p10), %s166_s5, 3  ;;  %s401_s7 = sshll.u32 (!%p143_p10), %s545_s12, 7 }
  0x11   : > { %s168_s8 = scalar_lea.vmem (!%p143_p10), [#allocation3], %s388_s6  ;;  %s646_s20 = scalar_lea.hbm (!%p143_p10), %s696_s2, %s401_s7 }
  0x12   : > { %s309_s15 = sshll.u32 (!%p143_p10), %s168_s8, 4  ;;  %s558_s24 = smov (!%p143_p10), [#allocation3]   ;;  %s648_s15 = int_to_ptr.vmem [resolvable:$true] %s309_s15 }
  0x13   : > { %s477_s23 = scalar_lea.vmem (!%p143_p10), %s648_s15, 128  ;;  %s481_s25 = sshll.u32 (!%p143_p10), %s558_s24, 4  ;;  %s482_s25 = int_to_ptr.vmem [resolvable:$false] %s481_s25 }
  0x14   : > { %v475_v0 = vld [vmem:[%s695_s1] sm:$0xff]   ;;  %vm186_vm0 = vcmask 7168   ;;  %v190_v1 = vlaneseq  ;;  %v476_v2 = vld [vmem:[%s695_s1 + $0x8] sm:$0xff]   ;;  %v555_v3 = vmov 0.0   ;;  %vm556_vm1 = vmmov 0   ;;  %s172_s27 = scalar_select %p171_p11, %s545_s12, 1 }
  0x15   : > { %220 = vxpose.xlu0.c.b16.start [1/2] (short) (narrow) %v475_v0, 16  ;;  %187 = vst.msk [vmem:[#allocation2] sm:$0xff] %vm186_vm0, %v555_v3  ;;  %408 = vmatprep.subr.bf16.mxu0 %v555_v3  ;;  %vm236_vm4 = vcmask 261120   ;;  %s295_s12 = scalar_lea.sflag [#allocation4], %s166_s5  ;;  %p478_p12 = scmp.ne.s32.totalorder %s648_s15, %s477_s23 }
  0x16   : > { %v191_v4 = vand.u32 127, %v190_v1  ;;  %412 = vmatprep.mubr.msk.bf16.mxu0 %vm556_vm1, %v555_v3  ;;  %s404_s28 = sshll.u32 %s172_s27, 5  ;;  %s483_s26 = scalar_lea.vmem %s482_s25, 256 }
  0x17   : > { %s178_s3 = scalar_lea.vmem %s694_s0, %s404_s28  ;;  %p479_p13 = pnand %p478_p12, %p614_p4 }
  0x18   : > { %vm193_vm2 = vcmp.lt.s32.totalorder %v191_v4, 16  ;;  %v196_v5 = vld [vmem:[%s178_s3 + $0x10] sm:$0xff]  ;;  %v197_v6 = vld [vmem:[%s178_s3 + $0x18] sm:$0xff]  ;;  %v194_v7 = vld [vmem:[%s178_s3] sm:$0xff]  ;;  %p484_p1 = scmp.lt.s32.totalorder %s648_s15, %s482_s25  ;;  %p485_p2 = scmp.lt.s32.totalorder %s483_s26, %s477_s23 }
  0x19   : > { %221 = vxpose.xlu0.c.b16.end [2/2] (short) (narrow) %v476_v2, 16  ;;  %vm393_vm3 = vmpackc.low %vm193_vm2, %vm193_vm2  ;;  %v394_v8 = vpack.c.bf16 %v197_v6, %v196_v5  ;;  %v195_v9 = vld [vmem:[%s178_s3 + $0x8] sm:$0xff]  ;;  %p480_p0 = pneg %p479_p13 }
  0x1a   : > { %v397_v10 = vpack.c.bf16 %v195_v9, %v194_v7  ;;  %p486_p3 = por %p485_p2, %p484_p1 }
  0x1b   : > { %409 = vmatpush3.bf16.msk.msra.mxu0 %vm393_vm3, %v394_v8 }
  0x1c   : > { %410 = vmatprep.subr.bf16.mxu0 %v555_v3  ;;  %v285_v16 = vld [vmem:[#allocation2] sm:$0xff]  ;;  %p487_p5 = pnand %p486_p3, %p480_p0 }
  0x1f   : > { %411 = vmatpush3.bf16.msk.msra.mxu0 %vm393_vm3, %v397_v10 }
  0x77   : > { %v228_v11 = vpop.trf.xlu0 }
  0x78   : > { %413 = vmatmul.mubr.msk.bf16.vlgmr.msra.gmra.mxu0 %vm236_vm4, %v228_v11 }
 0x138   : > { %v274_v12 = vpop.f32.mrf.mxu0 }
 0x139   : > { %v286_v19 = vadd.f32 %v285_v16, %v274_v12 }
 0x13a   : > { %v414_v13 = vpop.f32.mrf.mxu0 }
 0x13c   : > { %v277_v14 = vpop.f32.mrf.mxu0 }
 0x13d   : > { %281 = vrot.lane.b32.xlu1 %v277_v14, %s557_s4 }
 0x13e   : > { %v415_v15 = vpop.f32.mrf.mxu0 }
 0x141   : > { %290 = vrot.lane.b32.xlu1 %v277_v14, %s557_s4 }
 0x1af   : > { %v282_v17 = vpop.permute.xlu1 %281 }
 0x1b0   : > { %v283_v18 = vadd.f32 %v282_v17, %v274_v12 }
 0x1b2   : > { %284 = vst [vmem:[%s168_s8] sm:$0xff] %v283_v18 }
 0x1b3   : > { %288 = vst.msk [vmem:[%s168_s8] sm:$0xff] %vm186_vm0, %v286_v19  ;;  %v291_v20 = vpop.permute.xlu1 %290 }
 0x1b4   : > { %293 = vst.msk [vmem:[#allocation2] sm:$0xff] %vm186_vm0, %v291_v20 }
 0x1b5   : > { %490 = shalt.err (!%p487_p5)
}
 0x1b6   : > { %s491_s27 = scalar_lea.hbm %s646_s20, 128  ;;  %s495_s30 = scalar_lea.hbm %s696_s2, 256 }
 0x1b7   : > { %p492_p6 = scmp.ne.s32.totalorder %s646_s20, %s491_s27  ;;  %p496_p10 = scmp.lt.s32.totalorder %s646_s20, %s696_s2 }
 0x1b8   : > { %p497_p11 = scmp.lt.s32.totalorder %s495_s30, %s491_s27 }
 0x1b9   : > { %p493_p7 = pnand %p492_p6, %p614_p4 }
 0x1ba   : > { %p498_p12 = por %p497_p11, %p496_p10 }
 0x1bb   : > { %p494_p9 = pneg %p493_p7 }
 0x1bd   : > { %p499_p13 = pnand %p498_p12, %p494_p9 }
 0x1bf   : > { %502 = shalt.err (!%p499_p13)
}
 0x1c0   : > { %416 = dma.vmem_to_hbm [thread:$0]  (%p614_p4), %s648_s15, 128, %s646_s20, %s295_s12  }
 0x1c1 PF: > { %p422_p0 = scmp.ge.s32.totalorder %s553_s14, 2  ;;  %s321_s5 = sand.u32 1, %s533_s9  }
 0x1c2   : > { %s322_s6 = scalar_lea.sflag [#allocation4], %s321_s5 }
 0x1c3   : > { %p419_p1 = pnand %p422_p0, %p621_p8 }
 0x1c5   : > { %p420_p2 = pneg %p419_p1 }
 0x1c7   : > { %528 = dma.done.wait (%p420_p2), %s322_s6, 128  }
 0x1c8   : > { %530 = vsyncadd (%p420_p2), %s322_s6, 4294967168  ;;  %s15_s14 = sadd.s32 1, %s553_s14   ;;  %s699_s9 = smov %s537_s10 }
 0x1c9   : > { %p12_p3 = scmp.ge.s32.totalorder %s15_s14, 4   ;;  %s700_s10 = smov %s541_s11 }
 0x1ca   : > { %s701_s11 = smov %s627_s22  ;;  %s702_s12 = smov %s549_s13 }
 0x1cb   : > { %s703_s13 = smov %s705_s17  ;;  %14 = sbr.rel (!%p12_p3) target bundleno = 4 (0x4), region = 67 }
 0x1d0   :  { %327 = vsyncpa [#allocation4], 1 }
 0x1d1   :  { %329 = vsyncpa [#allocation4 + $0x1], 1 }

</bundles_post_ra>
